<compile_context>
chip_gen: v7x
topology: tpu7x:2x2x1
jax: 0.10.0
libtpu: 0.0.40
codegen_flags: <defaults>
</compile_context>

<pallas_src>
from functools import partial

import jax
import jax.numpy as jnp
import numpy as np
from jax.experimental import pallas as pl
from jax.experimental.pallas import tpu as pltpu


# --------------------------------------------------------------------------
# Helpers
# --------------------------------------------------------------------------
def _round_up(x, m):
    return ((x + m - 1) // m) * m


def _cdiv(a, b):
    return -(-a // b)


def _vmem_budget():
    """Generation-aware VMEM budgeting.

    Returns (vmem_limit_bytes, per_block_budget_bytes, is_small_vmem_multi_tc).
    """
    cap = None
    try:
        cap = int(pltpu.get_tpu_info().vmem_capacity_bytes)
    except Exception:
        cap = None
    detected = cap is not None and cap > 0
    if not detected:
        cap = 64 * 1024 * 1024  # conservative (v7x-class) fallback
    # ~3/4 of physical VMEM, capped at 100 MiB: ~96 MiB on v5e/v6e (128 MiB),
    # ~48 MiB on v7x (64 MiB per TensorCore).
    vmem_limit = min(100 * 1024 * 1024, max(16 * 1024 * 1024, (cap * 3) // 4))
    # Per (C, HW-tile) block budget: 2x input + 2x output (double-buffered
    # pipeline) plus the in-kernel scale intermediate and headroom -> /6.
    block_budget = vmem_limit // 6
    # v7x is the only generation with <=64 MiB VMEM, and it has 2 TensorCores.
    small_vmem_multi_tc = detected and cap <= 64 * 1024 * 1024
    return vmem_limit, block_budget, small_vmem_multi_tc


def _pick_hw_tile(hw, c, itemsize, budget_bytes, min_tiles=None):
    """Largest 128-aligned HW tile whose (C, tile) block fits the budget.

    The grid uses cdiv(hw, tile), so the tile need NOT divide hw (the ragged
    tail block is masked by Pallas).  Never falls back to the full HW when it
    does not fit the budget."""
    t = (budget_bytes // max(1, c * itemsize)) // 128 * 128
    t = max(128, t)
    if min_tiles is not None and min_tiles >= 2:
        t = min(t, max(128, _round_up(_cdiv(hw, min_tiles), 128)))
    t = min(t, _round_up(hw, 128))
    return t


def _sigmoid(x, approx):
    # exp lands on the EUP; approx reciprocal also goes to the EUP (vrcp),
    # keeping the whole sigmoid off the VALU path. approx adds ~1e-3 rel error.
    return pl.reciprocal(1.0 + jnp.exp(-x), approx=approx)


# --------------------------------------------------------------------------
# Fused path: one batch element per grid step, SE block computed in-kernel.
# --------------------------------------------------------------------------
def _attention_block_fused_kernel(x_ref, w1_ref, wsq_t_ref, wex_ref, o_ref, *,
                                  approx):
    # x_ref    : (1, C, HW)  one batch element (channels on sublanes, HW on lanes)
    # w1_ref   : (1, C)      Conv1x1 weight, in the input dtype
    # wsq_t_ref: (C, Cr)     Conv_Squeeze weight transposed, f32
    # wex_ref  : (C, Cr)     Conv_Excitation weight, f32
    x = x_ref[0]                                                       # (C, HW), native dtype

    # Spatial attention: (1,C)@(C,HW) on the MXU, f32 accumulation, lane-dense.
    s = jnp.dot(w1_ref[...], x, preferred_element_type=jnp.float32)    # (1, HW) f32
    att1 = _sigmoid(s, approx)

    # Channel attention (SE).  Global average pool accumulates in f32.
    pooled = jnp.mean(x, axis=-1, keepdims=True, dtype=jnp.float32)    # (C, 1)
    # Squeeze: z_r = sum_c Wsq[r, c] * pooled[c]   (VPU mul + sublane reduce)
    z = jnp.sum(wsq_t_ref[...] * pooled, axis=0, keepdims=True)        # (1, Cr)
    # Excite:  e_c = sum_r Wex[c, r] * z[r]        (VPU mul + lane reduce)
    e = jnp.sum(wex_ref[...] * z, axis=1, keepdims=True)               # (C, 1)
    att2 = _sigmoid(e, approx)                                         # (C, 1) f32

    # out = x * (1 + att1 * att2): the big elementwise work stays in the input
    # dtype (only the thin attention factors are cast), so bf16 inputs never
    # materialize an f32 copy of the tile.
    dt = x.dtype
    scale = 1.0 + att1.astype(dt) * att2.astype(dt)                    # (C, HW)
    o_ref[0] = (x * scale).astype(o_ref.dtype)


# --------------------------------------------------------------------------
# Tiled path: channel attention precomputed, spatial apply tiled over HW.
# --------------------------------------------------------------------------
def _attention_block_apply_kernel(x_ref, w1_ref, att2_ref, o_ref, *, approx):
    # x_ref   : (1, C, T)  HW tile (the last tile may be a masked ragged tail)
    # w1_ref  : (1, C)     input dtype
    # att2_ref: (1, C, 1)  precomputed channel attention, f32
    x = x_ref[0]                                                       # (C, T)
    s = jnp.dot(w1_ref[...], x, preferred_element_type=jnp.float32)    # (1, T)
    att1 = _sigmoid(s, approx)
    dt = x.dtype
    scale = 1.0 + att1.astype(dt) * att2_ref[0].astype(dt)             # (C, T)
    o_ref[0] = (x * scale).astype(o_ref.dtype)


# --------------------------------------------------------------------------
# Wrapper
# --------------------------------------------------------------------------
def attention_block_pallas(x_nchw, w_conv1x1, w_squeeze, w_excite, *,
                           hw_tile=None, approx_sigmoid=True):
    """x_nchw: (B, C, H, W).  Conv weights in PyTorch layout:
       w_conv1x1: (1, C, 1, 1), w_squeeze: (Cr, C, 1, 1), w_excite: (C, Cr, 1, 1)."""
    B, C, H, W = x_nchw.shape
    Cr = w_squeeze.shape[0]
    HW = H * W
    dtype = x_nchw.dtype
    itemsize = jnp.dtype(dtype).itemsize

    # Free reshape (no data movement): NCHW viewed as (B, C, HW).
    x = x_nchw.reshape(B, C, HW)

    # Tiny weights.  w1 matches the input dtype so the MXU matmul runs on the
    # native tile (bf16 stays bf16); SE weights stay f32 (thin vectors only).
    w1 = w_conv1x1.reshape(1, C).astype(dtype)                 # (1, C)
    wsq_t = w_squeeze.reshape(Cr, C).T.astype(jnp.float32)     # (C, Cr)
    wex = w_excite.reshape(C, Cr).astype(jnp.float32)          # (C, Cr)

    vmem_limit, block_budget, small_vmem_multi_tc = _vmem_budget()

    block_bytes = C * HW * itemsize
    if hw_tile is None:
        use_fused = block_bytes <= block_budget
        # On a 2-TensorCore chip (v7x) a grid of (B,)==(1,) leaves one core
        # idle; prefer the 2-D tiled grid for single-batch inputs.
        if small_vmem_multi_tc and B == 1 and HW >= 256:
            use_fused = False
    else:
        use_fused = hw_tile >= HW

    if use_fused:
        # Single-pass fused kernel: read x once, write out once; SE in-kernel.
        cost = pl.CostEstimate(
            flops=int(B * (6 * C * HW + 4 * C * Cr)),
            transcendentals=int(B * (HW + C)),
            bytes_accessed=int(2 * B * C * HW * itemsize),
        )
        kernel = partial(_attention_block_fused_kernel, approx=approx_sigmoid)
        out = pl.pallas_call(
            kernel,
            out_shape=jax.ShapeDtypeStruct((B, C, HW), dtype),
            grid_spec=pltpu.PrefetchScalarGridSpec(
                num_scalar_prefetch=0,
                grid=(B,),
                in_specs=[
                    pl.BlockSpec((1, C, HW), lambda b: (b, 0, 0)),
                    pl.BlockSpec((1, C), lambda b: (0, 0)),
                    pl.BlockSpec((C, Cr), lambda b: (0, 0)),
                    pl.BlockSpec((C, Cr), lambda b: (0, 0)),
                ],
                out_specs=pl.BlockSpec((1, C, HW), lambda b: (b, 0, 0)),
            ),
            compiler_params=pltpu.CompilerParams(
                dimension_semantics=("parallel",),
                vmem_limit_bytes=vmem_limit,
            ),
            cost_estimate=cost,
        )(x, w1, wsq_t, wex)
    else:
        if hw_tile is None:
            min_tiles = 2 if (small_vmem_multi_tc and B == 1) else None
            hw_tile = _pick_hw_tile(HW, C, itemsize, block_budget, min_tiles)
        else:
            hw_tile = max(128, (int(hw_tile) // 128) * 128)  # lane-dense stores
        nt = _cdiv(HW, hw_tile)

        # Channel attention precompute: tiny (B, C) reduction + two small
        # matmuls in plain XLA (re-reads x once from HBM).
        # TODO(synk): fold this pool into the Pallas pipeline (two-pass
        # emit_pipeline over HW) to drop the extra read for shapes just above
        # the fused-path budget.
        pooled = jnp.mean(x, axis=-1, dtype=jnp.float32)       # (B, C)
        z = pooled @ wsq_t                                     # (B, Cr)
        e = z @ wex.T                                          # (B, C)
        att2 = jax.nn.sigmoid(e).reshape(B, C, 1)              # (B, C, 1) f32

        cost = pl.CostEstimate(
            flops=int(B * 6 * C * HW),
            transcendentals=int(B * HW),
            # 3x tensor bytes: pooling sweep feeding this op + kernel read + write.
            bytes_accessed=int(3 * B * C * HW * itemsize),
        )
        kernel = partial(_attention_block_apply_kernel, approx=approx_sigmoid)
        out = pl.pallas_call(
            kernel,
            out_shape=jax.ShapeDtypeStruct((B, C, HW), dtype),
            grid_spec=pltpu.PrefetchScalarGridSpec(
                num_scalar_prefetch=0,
                grid=(B, nt),
                in_specs=[
                    pl.BlockSpec((1, C, hw_tile), lambda b, t: (b, 0, t)),
                    pl.BlockSpec((1, C), lambda b, t: (0, 0)),
                    pl.BlockSpec((1, C, 1), lambda b, t: (b, 0, 0)),
                ],
                out_specs=pl.BlockSpec((1, C, hw_tile), lambda b, t: (b, 0, t)),
            ),
            compiler_params=pltpu.CompilerParams(
                dimension_semantics=("parallel", "parallel"),
                vmem_limit_bytes=vmem_limit,
            ),
            cost_estimate=cost,
        )(x, w1, att2)

    return out.reshape(B, C, H, W)


def attention_block_ref(x_nchw, w_conv1x1, w_squeeze, w_excite):
    """Pure-JAX reference mirroring the PyTorch forward (bias=False, no ReLU)."""
    B, C, H, W = x_nchw.shape
    Cr = w_squeeze.shape[0]
    w1 = w_conv1x1.reshape(1, C)
    wsq = w_squeeze.reshape(Cr, C)
    wex = w_excite.reshape(C, Cr)

    att1 = jax.nn.sigmoid(jnp.einsum("oc,bchw->bohw", w1, x_nchw))        # (B,1,H,W)
    pooled = jnp.mean(x_nchw, axis=(2, 3))                                # (B,C)
    z = pooled @ wsq.T                                                    # (B,Cr)
    e = z @ wex.T                                                         # (B,C)
    att2 = jax.nn.sigmoid(e)[:, :, None, None]                            # (B,C,1,1)
    return att1 * att2 * x_nchw + x_nchw


if __name__ == "__main__":
    # Small shapes consistent with the module (input_channels // 16 must be >= 1).
    B, C, H, W = 2, 32, 16, 16
    Cr = C // 16

    key = jax.random.PRNGKey(0)
    kx, k1, k2, k3 = jax.random.split(key, 4)

    x = jax.random.normal(kx, (B, C, H, W), dtype=jnp.float32)
    # PyTorch conv weight layout (O, I, 1, 1); all convs bias=False.
    w_conv1x1 = jax.random.normal(k1, (1, C, 1, 1), dtype=jnp.float32) * 0.1
    w_squeeze = jax.random.normal(k2, (Cr, C, 1, 1), dtype=jnp.float32) * 0.1
    w_excite = jax.random.normal(k3, (C, Cr, 1, 1), dtype=jnp.float32) * 0.1

    ref = attention_block_ref(x, w_conv1x1, w_squeeze, w_excite)

    # 1) Fused path, exact sigmoid -> tight numerical check of the structure.
    out = jax.block_until_ready(
        attention_block_pallas(x, w_conv1x1, w_squeeze, w_excite,
                               approx_sigmoid=False))
    np.testing.assert_allclose(np.asarray(out), np.asarray(ref),
                               rtol=1e-5, atol=1e-5)

    # 2) Fused path, default approx sigmoid (EUP reciprocal, ~1e-3 rel error).
    out = jax.block_until_ready(
        attention_block_pallas(x, w_conv1x1, w_squeeze, w_excite))
    np.testing.assert_allclose(np.asarray(out), np.asarray(ref),
                               rtol=5e-3, atol=5e-3)

    # 3) Forced tiled path (HW = 256 divisible by the tile -> lane-dense stores).
    out_tiled = jax.block_until_ready(
        attention_block_pallas(x, w_conv1x1, w_squeeze, w_excite, hw_tile=128))
    np.testing.assert_allclose(np.asarray(out_tiled), np.asarray(ref),
                               rtol=5e-3, atol=5e-3)

    # 4) Forced tiled path with a ragged tail (HW = 400 is not a multiple of 128).
    xr = jax.random.normal(kx, (B, C, 20, 20), dtype=jnp.float32)
    ref_r = attention_block_ref(xr, w_conv1x1, w_squeeze, w_excite)
    out_r = jax.block_until_ready(
        attention_block_pallas(xr, w_conv1x1, w_squeeze, w_excite, hw_tile=128))
    np.testing.assert_allclose(np.asarray(out_r), np.asarray(ref_r),
                               rtol=5e-3, atol=5e-3)

    # 5) bf16 I/O (halves HBM traffic; big elementwise work stays bf16 in-kernel).
    x_bf16 = x.astype(jnp.bfloat16)
    out_bf16 = jax.block_until_ready(
        attention_block_pallas(x_bf16, w_conv1x1, w_squeeze, w_excite))
    ref_bf16 = attention_block_ref(x_bf16.astype(jnp.float32),
                                   w_conv1x1, w_squeeze, w_excite)
    np.testing.assert_allclose(np.asarray(out_bf16.astype(jnp.float32)),
                               np.asarray(ref_bf16), rtol=5e-2, atol=5e-2)

    print("KERNEL_OK")
</pallas_src>

<mosaic_0001>
module attributes {stable_mosaic.version = 11 : i64} {
  func.func @_attention_block_fused_kernel(%arg0: i32, %arg1: memref<1x32x256xf32, #tpu.memory_space<vmem>>, %arg2: memref<1x32xf32, #tpu.memory_space<vmem>>, %arg3: memref<32x2xf32, #tpu.memory_space<vmem>>, %arg4: memref<32x2xf32, #tpu.memory_space<vmem>>, %arg5: memref<1x32x256xf32, #tpu.memory_space<vmem>>) attributes {dimension_semantics = [#tpu.dimension_semantics<parallel>], iteration_bounds = array<i64: 2>, scalar_prefetch = 0 : i64, scratch_operands = 0 : i64, tpu.core_type = #tpu.core_type<tc>, window_params = [{transform_indices = @transform_0, window_bounds = array<i64: 1, 32, 256>}, {pipeline_mode = #tpu.pipeline_mode<synchronous>, transform_indices = @transform_1, window_bounds = array<i64: 1, 32>}, {pipeline_mode = #tpu.pipeline_mode<synchronous>, transform_indices = @transform_2, window_bounds = array<i64: 32, 2>}, {pipeline_mode = #tpu.pipeline_mode<synchronous>, transform_indices = @transform_3, window_bounds = array<i64: 32, 2>}, {transform_indices = @transform_4, window_bounds = array<i64: 1, 32, 256>}]} {
    %c0 = arith.constant 0 : index
    %c0_0 = arith.constant 0 : index
    %c0_1 = arith.constant 0 : index
    %0 = vector.load %arg1[%c0, %c0_0, %c0_1] : memref<1x32x256xf32, #tpu.memory_space<vmem>>, vector<1x32x256xf32>
    %1 = vector.shape_cast %0 : vector<1x32x256xf32> to vector<32x256xf32>
    %c0_2 = arith.constant 0 : index
    %c0_3 = arith.constant 0 : index
    %2 = vector.load %arg2[%c0_2, %c0_3] : memref<1x32xf32, #tpu.memory_space<vmem>>, vector<1x32xf32>
    %cst = arith.constant dense<0.000000e+00> : vector<1x256xf32>
    %3 = tpu.matmul %2, %1, %cst {dimension_numbers = #tpu.dot_dimension_numbers<[1], [0], [0], [1], [0, 0, 1, 1], [], []>} : vector<1x32xf32>, vector<32x256xf32>, vector<1x256xf32> -> vector<1x256xf32>
    %cst_4 = arith.constant 0.000000e+00 : f32
    %4 = vector.broadcast %cst_4 : f32 to vector<1x256xf32>
    %5 = arith.subf %4, %3 : vector<1x256xf32>
    %6 = math.exp %5 : vector<1x256xf32>
    %cst_5 = arith.constant 1.000000e+00 : f32
    %7 = vector.broadcast %cst_5 : f32 to vector<1x256xf32>
    %8 = arith.addf %7, %6 : vector<1x256xf32>
    %9 = tpu.reciprocal %8 : vector<1x256xf32> -> vector<1x256xf32>
    %cst_6 = arith.constant dense<0.000000e+00> : vector<32xf32>
    %10 = vector.multi_reduction <add>, %1, %cst_6 [1] : vector<32x256xf32> to vector<32xf32>
    %11 = vector.shape_cast %10 : vector<32xf32> to vector<32x1xf32>
    %cst_7 = arith.constant 2.560000e+02 : f32
    %12 = vector.broadcast %cst_7 : f32 to vector<32x1xf32>
    %13 = arith.divf %11, %12 : vector<32x1xf32>
    %c0_8 = arith.constant 0 : index
    %c0_9 = arith.constant 0 : index
    %14 = vector.load %arg3[%c0_8, %c0_9] : memref<32x2xf32, #tpu.memory_space<vmem>>, vector<32x2xf32>
    %15 = vector.broadcast %13 : vector<32x1xf32> to vector<32x2xf32>
    %16 = arith.mulf %14, %15 : vector<32x2xf32>
    %cst_10 = arith.constant dense<0.000000e+00> : vector<2xf32>
    %17 = vector.multi_reduction <add>, %16, %cst_10 [0] : vector<32x2xf32> to vector<2xf32>
    %18 = vector.shape_cast %17 : vector<2xf32> to vector<1x2xf32>
    %c0_11 = arith.constant 0 : index
    %c0_12 = arith.constant 0 : index
    %19 = vector.load %arg4[%c0_11, %c0_12] : memref<32x2xf32, #tpu.memory_space<vmem>>, vector<32x2xf32>
    %20 = vector.broadcast %18 : vector<1x2xf32> to vector<32x2xf32>
    %21 = arith.mulf %19, %20 : vector<32x2xf32>
    %cst_13 = arith.constant dense<0.000000e+00> : vector<32xf32>
    %22 = vector.multi_reduction <add>, %21, %cst_13 [1] : vector<32x2xf32> to vector<32xf32>
    %23 = vector.shape_cast %22 : vector<32xf32> to vector<32x1xf32>
    %cst_14 = arith.constant 0.000000e+00 : f32
    %24 = vector.broadcast %cst_14 : f32 to vector<32x1xf32>
    %25 = arith.subf %24, %23 : vector<32x1xf32>
    %26 = math.exp %25 : vector<32x1xf32>
    %cst_15 = arith.constant 1.000000e+00 : f32
    %27 = vector.broadcast %cst_15 : f32 to vector<32x1xf32>
    %28 = arith.addf %27, %26 : vector<32x1xf32>
    %29 = tpu.reciprocal %28 : vector<32x1xf32> -> vector<32x1xf32>
    %30 = vector.broadcast %9 : vector<1x256xf32> to vector<32x256xf32>
    %31 = vector.broadcast %29 : vector<32x1xf32> to vector<32x256xf32>
    %32 = arith.mulf %30, %31 : vector<32x256xf32>
    %cst_16 = arith.constant 1.000000e+00 : f32
    %33 = vector.broadcast %cst_16 : f32 to vector<32x256xf32>
    %34 = arith.addf %33, %32 : vector<32x256xf32>
    %35 = arith.mulf %1, %34 : vector<32x256xf32>
    %c0_17 = arith.constant 0 : index
    %c0_18 = arith.constant 0 : index
    %c0_19 = arith.constant 0 : index
    %36 = vector.load %arg5[%c0_17, %c0_18, %c0_19] : memref<1x32x256xf32, #tpu.memory_space<vmem>>, vector<1x32x256xf32>
    %37 = vector.shape_cast %36 : vector<1x32x256xf32> to vector<32x256xf32>
    %38 = vector.shape_cast %35 : vector<32x256xf32> to vector<1x32x256xf32>
    tpu.vector_store %arg5[%c0_17, %c0_18, %c0_19], %38 {strides = array<i32>} : memref<1x32x256xf32, #tpu.memory_space<vmem>>, vector<1x32x256xf32>,
    return
  }
  func.func @transform_0(%arg0: i32) -> (i32, i32, i32) {
    %c0_i32 = arith.constant 0 : i32
    %c0_i32_0 = arith.constant 0 : i32
    %c0_i32_1 = arith.constant 0 : i32
    return %arg0, %c0_i32, %c0_i32_0 : i32, i32, i32
  }
  func.func @transform_1(%arg0: i32) -> (i32, i32) {
    %c0_i32 = arith.constant 0 : i32
    %c0_i32_0 = arith.constant 0 : i32
    %c0_i32_1 = arith.constant 0 : i32
    return %c0_i32, %c0_i32_0 : i32, i32
  }
  func.func @transform_2(%arg0: i32) -> (i32, i32) {
    %c0_i32 = arith.constant 0 : i32
    %c0_i32_0 = arith.constant 0 : i32
    %c0_i32_1 = arith.constant 0 : i32
    return %c0_i32, %c0_i32_0 : i32, i32
  }
  func.func @transform_3(%arg0: i32) -> (i32, i32) {
    %c0_i32 = arith.constant 0 : i32
    %c0_i32_0 = arith.constant 0 : i32
    %c0_i32_1 = arith.constant 0 : i32
    return %c0_i32, %c0_i32_0 : i32, i32
  }
  func.func @transform_4(%arg0: i32) -> (i32, i32, i32) {
    %c0_i32 = arith.constant 0 : i32
    %c0_i32_0 = arith.constant 0 : i32
    %c0_i32_1 = arith.constant 0 : i32
    return %arg0, %c0_i32, %c0_i32_0 : i32, i32, i32
  }
}

</mosaic_0001>

<bundles_post_ra>
// kernel: tpu_custom_call.1
= control target key start
LH: loop header
LB: loop body
LE: loop exit
PB: predicated region body
PF: predicated region fallthrough
CT: control target
= control target key end

     0   :  { %9 = vsyncpa [#allocation3], 0  ;;  %s987_s0 = inlined_call_operand.hbm [shape: f32[2,32,256], index: 0, kind: input, shape index: {}]   ;;  %s988_s1 = inlined_call_operand.vmem [shape: f32[1,32], index: 1, kind: input, shape index: {}]   ;;  %s989_s2 = inlined_call_operand.vmem [shape: f32[32,2], index: 2, kind: input, shape index: {}]   ;;  %s990_s3 = inlined_call_operand.vmem [shape: f32[32,2], index: 3, kind: input, shape index: {}]   ;;  %s991_s4 = inlined_call_operand.hbm [shape: f32[2,32,256], index: 4, kind: output, shape index: {}]  }
   0x1   :  { %11 = vsyncpa [#allocation3 + $0x1], 0 }
   0x2   :  { %12 = vsyncpa [#allocation4], 0 }
   0x3   :  { %14 = vsyncpa [#allocation4 + $0x1], 0  ;;  %s746_s15 = smov 0   ;;  %s748_s16 = smov 0  }
   0x4   :  { %s750_s17 = smov 0   ;;  %s752_s18 = smov 0  }
   0x5 LB: > { %s767_s19 = sadd.s32 4294967295, %s712_s18   ;;  %s516_s20 = sadd.s32 4294967294, %s712_s18   ;;  %s712_s18 = sphi %s752_s18, %s1004_s18   ;;  %s708_s17 = sphi %s750_s17, %s1003_s17   ;;  %s704_s16 = sphi %s748_s16, %s1002_s16   ;;  %s700_s15 = sphi %s746_s15, %s1001_s15  }
   0x6   : > { %s771_s21 = sadd.s32 1, %s712_s18   ;;  %s27_s22 = sadd.s32 1, %s708_s17 }
   0x7   : > { %s24_s23 = ssub.s32 %s712_s18, %s771_s21  ;;  %p34_p0 = scmp.ne.s32.totalorder %s708_s17, %s704_s16 }
   0x8   : > { %p25_p1 = scmp.eq.s32.totalorder %s24_s23, 0  ;;  %p35_p2 = scmp.eq.s32.totalorder %s712_s18, 0 }
   0x9   : > { %p40_p3 = scmp.ne.s32.totalorder %s704_s16, %s700_s15  ;;  %p41_p4 = scmp.eq.s32.totalorder %s767_s19, 0 }
   0xa   : > { %s783_s24 = scalar_select %p25_p1, %s708_s17, %s27_s22  }
   0xb   : > { %p785_p5 = por %p35_p2, %p34_p0  ;;  %p789_p6 = por %p41_p4, %p40_p3 }
   0xc   : > { %p127_p7 = scmp.eq.s32.totalorder %s767_s19, 1  ;;  %p133_p8 = scmp.eq.s32.totalorder %s516_s20, 1 }
   0xd   : > { %p553_p10 = scmp.lt.s32.totalorder %s712_s18, 2  ;;  %s162_s29 = sand.u32 1, %s708_s17  }
   0xe   : > { %p796_p11 = por %p127_p7, %p34_p0  ;;  %p800_p12 = por %p133_p8, %p40_p3 }
   0xf   : > { %s531_s30 = sshll.u32 %s712_s18, 10  ;;  %s519_s5 = sshll.u32 %s162_s29, 6 }
  0x10   : > { %s995_s27 = scalar_select %p796_p11, 1, 0 }
  0x11   : > { %s996_s28 = scalar_select %p800_p12, 1, 0 }
  0x12   : > { %s809_s8 = scalar_lea.hbm %s987_s0, %s531_s30  ;;  %s166_s9 = scalar_lea.vmem [#allocation2], %s519_s5 }
  0x13   : > { %s173_s10 = sshll.u32 %s166_s9, 4  ;;  %p813_p13 = pnand %p553_p10, %p785_p5  ;;  %s817_s10 = int_to_ptr.vmem [resolvable:$true] %s173_s10 }
  0x14   : > { %s819_s12 = scalar_lea.sflag [#allocation3], %s162_s29  ;;  %s616_s13 = scalar_lea.hbm %s809_s8, 1024 }
  0x15   : > { %p617_p0 = scmp.ne.s32.totalorder %s809_s8, %s616_s13  ;;  %p618_p1 = pneg %p813_p13 }
  0x16   : > { %s621_s22 = scalar_lea.hbm %s987_s0, 2048  ;;  %p622_p4 = scmp.lt.u32.totalorder %s809_s8, %s987_s0 }
  0x17   : > { %p619_p2 = pnand %p618_p1, %p617_p0  ;;  %p623_p5 = scmp.lt.u32.totalorder %s621_s22, %s616_s13 }
  0x18   : > { %p625_p8 = scmp.lt.u32.totalorder %s616_s13, %s809_s8 }
  0x19   : > { %p620_p3 = pneg %p619_p2  ;;  %p624_p7 = por %p623_p5, %p622_p4 }
  0x1b   : > { %p626_p10 = por %p625_p8, %p624_p7 }
  0x1d   : > { %p627_p9 = pnand %p626_p10, %p620_p3 }
  0x1f   : > { %630 = shalt.err (!%p627_p9)
}
  0x20   : > { %s631_s29 = scalar_lea.vmem %s817_s10, 1024  ;;  %s714_s30 = smov [#allocation2]  }
  0x21   : > { %p632_p0 = scmp.ne.s32.totalorder %s817_s10, %s631_s29  ;;  %s636_s5 = sshll.u32 %s714_s30, 4  ;;  %s637_s5 = int_to_ptr.vmem [resolvable:$false] %s636_s5 }
  0x22   : > { %s638_s6 = scalar_lea.vmem %s637_s5, 2048  ;;  %p639_p11 = scmp.lt.s32.totalorder %s817_s10, %s637_s5 }
  0x23   : > { %p634_p2 = pnand %p632_p0, %p618_p1  ;;  %p640_p4 = scmp.lt.s32.totalorder %s638_s6, %s631_s29 }
  0x25   : > { %p635_p12 = pneg %p634_p2  ;;  %p641_p5 = por %p640_p4, %p639_p11 }
  0x27   : > { %p642_p7 = pnand %p641_p5, %p635_p12 }
  0x29   : > { %645 = shalt.err (!%p642_p7)
}
  0x2a   : > { %s715_s7 = smov 256   ;;  %s716_s9 = smov 16  }
  0x2b   : > { %548 = dma.hbm_to_vmem [thread:$0]  (!%p813_p13), %s809_s8, 1024, %s817_s10, %s819_s12, %s715_s7, %s715_s7, %s716_s9  }
  0x2c   : > { %p522_p9 = scmp.ge.s32.totalorder %s712_s18, 1  ;;  %p181_p1 = scmp.lt.s32.totalorder %s712_s18, 3 }
  0x2e   : > { %p182_p3 = pnand %p522_p9, %p181_p1 }
  0x2f   : > { %s850_s13 = sand.u32 (!%p182_p3), 1, %s704_s16  }
  0x30   : > { %185 = sbr.rel (%p182_p3) target bundleno = 427 (0x1ab), region = 36  ;;  %s523_s14 = sshll.u32 (!%p182_p3), %s850_s13, 6 }
  0x31   : > { %s188_s20 = scalar_lea.sflag (!%p182_p3), [#allocation3], %s850_s13  ;;  %s191_s22 = scalar_lea.vmem (!%p182_p3), [#allocation2], %s523_s14 }
  0x37   : > { %691 = dma.done.wait (%p789_p6), %s188_s20, 1024  }
  0x38   : > { %693 = vsyncadd (%p789_p6), %s188_s20, 4294966272  ;;  %v717_v0 = vmov 0.0   ;;  %v860_v1 = vld [vmem:[%s191_s22] sm:$0xff]  ;;  %v862_v2 = vld [vmem:[%s191_s22 + $0x8] sm:$0xff]  ;;  %vm225_vm0 = vcmask 261120   ;;  %vm335_vm1 = vcmask 15360  }
  0x39   : > { %293 = vmatprep.mubr.f32.mxu0 %v717_v0  ;;  %v864_v3 = vld [vmem:[%s191_s22 + $0x20] sm:$0xff]  ;;  %v310_v4 = vadd.f32 %v862_v2, %v860_v1  ;;  %v868_v5 = vld [vmem:[%s191_s22 + $0x28] sm:$0xff]  ;;  %v870_v6 = vld [vmem:[%s191_s22 + $0x10] sm:$0xff]  ;;  %s532_s11 = sshll.u32 %s767_s19, 10  ;;  %s215_s12 = scalar_lea.vmem [#allocation5], %s523_s14 }
  0x3a   : > { %v872_v7 = vld [vmem:[%s191_s22 + $0x18] sm:$0xff]  ;;  %v316_v8 = vadd.f32 %v868_v5, %v864_v3  ;;  %v876_v9 = vld [vmem:[%s191_s22 + $0x30] sm:$0xff]  ;;  %v535_v12 = vpack.c.bf16 %v870_v6, %v860_v1  ;;  %v224_v17 = vld [vmem:[%s988_s1] sm:$0x1]  ;;  %s443_s23 = sshll.u32 %s215_s12, 4  ;;  %s939_s19 = scalar_lea.hbm %s991_s4, %s532_s11  ;;  %s941_s23 = int_to_ptr.vmem [resolvable:$true] %s443_s23 }
  0x3b   : > { %v878_v10 = vld [vmem:[%s191_s22 + $0x38] sm:$0xff]  ;;  %v533_v11 = vpack.c.bf16 %v872_v7, %v862_v2  ;;  %311 = vadd.xlane.f32.xlu0 %v310_v4  ;;  %v313_v13 = vadd.f32 %v872_v7, %v870_v6  ;;  %v539_v16 = vpack.c.bf16 %v876_v9, %v864_v3  ;;  %v327_v21 = vld [vmem:[%s989_s2] sm:$0xff]  ;;  %v329_v23 = vld [vmem:[%s989_s2 + $0x10] sm:$0xff]  ;;  %s430_s14 = scalar_lea.sflag [#allocation4], %s850_s13  ;;  %s646_s30 = scalar_lea.vmem %s941_s23, 1024 }
  0x3c   : > { %v537_v14 = vpack.c.bf16 %v878_v10, %v868_v5  ;;  %317 = vadd.xlane.f32.xlu1 %v316_v8  ;;  %v319_v15 = vadd.f32 %v878_v10, %v876_v9  ;;  %v328_v24 = vld [vmem:[%s989_s2 + $0x8] sm:$0xff]  ;;  %v330_v28 = vld [vmem:[%s989_s2 + $0x18] sm:$0xff]  ;;  %v349_v47 = vld [vmem:[%s990_s3] sm:$0xff]  ;;  %p647_p6 = scmp.ne.s32.totalorder %s941_s23, %s646_s30  ;;  %p998_p11 = scmp.ne.s32.totalorder %s995_s27, 0 }
  0x3d   : > { %534 = vmatprep.subr.bf16.mxu0 %v533_v11  ;;  %v350_v46 = vld [vmem:[%s990_s3 + $0x8] sm:$0xff]  ;;  %v352_v49 = vld [vmem:[%s990_s3 + $0x18] sm:$0xff]  ;;  %v351_v50 = vld [vmem:[%s990_s3 + $0x10] sm:$0xff]  ;;  %s718_s5 = smov [#allocation5]  }
  0x3e   : > { %536 = vmatpush1.bf16.msra.mxu0 %v535_v12  ;;  %p648_p12 = pnand %p647_p6, %p998_p11  ;;  %s650_s6 = sshll.u32 %s718_s5, 4  ;;  %s651_s6 = int_to_ptr.vmem [resolvable:$false] %s650_s6 }
  0x3f   : > { %538 = vmatprep.subr.bf16.mxu0 %v537_v14  ;;  %314 = vadd.xlane.f32.xlu0 %v313_v13  ;;  %s652_s7 = scalar_lea.vmem %s651_s6, 2048  ;;  %p653_p8 = scmp.lt.s32.totalorder %s941_s23, %s651_s6 }
  0x40   : > { %320 = vadd.xlane.f32.xlu1 %v319_v15  ;;  %p649_p13 = pneg %p648_p12  ;;  %p654_p10 = scmp.lt.s32.totalorder %s652_s7, %s646_s30 }
  0x42   : > { %540 = vmatpush1.bf16.msra.mxu0 %v539_v16  ;;  %p655_p0 = por %p654_p10, %p653_p8 }
  0x44   : > { %p656_p2 = pnand %p655_p0, %p649_p13 }
  0x45   : > { %525 = vmatmul.mubr.msk.f32.vlgmr.msra.gmra.mrb[0].mxu0 %vm225_vm0, %v224_v17 }
  0xc8   : > { %v312_v18 = vpop.xlane.xlu0 %311 }
  0xc9   : > { %v323_v19 = vmul.f32 0.00390625, %v312_v18  ;;  %v318_v20 = vpop.xlane.xlu1 %317 }
  0xca   : > { %v325_v22 = vmul.f32 0.00390625, %v318_v20 }
  0xcb   : > { %v331_v26 = vmul.f32 %v327_v21, %v323_v19 }
  0xcc   : > { %v315_v25 = vpop.xlane.xlu0 %314  ;;  %v333_v31 = vmul.f32 %v329_v23, %v325_v22 }
  0xcd   : > { %v324_v27 = vmul.f32 0.00390625, %v315_v25  ;;  %v321_v29 = vpop.xlane.xlu1 %320  ;;  %v336_v34 = vsel %vm335_vm1, %v331_v26, 0.0  ;;  %v389_v25 = vlaneseq }
  0xce   : > { %v326_v30 = vmul.f32 0.00390625, %v321_v29  ;;  %v339_v37 = vsel %vm335_vm1, %v333_v31, 0.0 }
  0xcf   : > { %v332_v32 = vmul.f32 %v328_v24, %v324_v27  ;;  %v390_v29 = vshrl.u32 %v389_v25, 7 }
  0xd0   : > { %v334_v33 = vmul.f32 %v330_v28, %v326_v30 }
  0xd1   : > { %v337_v35 = vsel %vm335_vm1, %v332_v32, 0.0 }
  0xd2   : > { %v338_v36 = vadd.f32 %v337_v35, %v336_v34  ;;  %v341_v38 = vsel %vm335_vm1, %v334_v33, 0.0  ;;  %v391_v35 = vsub.s32 0, %v390_v29 }
  0xd4   : > { %v340_v39 = vadd.f32 %v339_v37, %v338_v36 }
  0xd6   : > { %v342_v40 = vadd.f32 %v341_v38, %v340_v39 }
  0xd8   : > { %v343_v41 = vrot.slane %v342_v40, 4 }
  0xda   : > { %v344_v42 = vadd.f32 %v343_v41, %v342_v40 }
  0xdc   : > { %v345_v43 = vrot.slane %v344_v42, 2 }
  0xde   : > { %v346_v44 = vadd.f32 %v345_v43, %v344_v42 }
  0xe0   : > { %v347_v45 = vrot.slane %v346_v44, 1 }
  0xe2   : > { %v348_v48 = vadd.f32 %v347_v45, %v346_v44 }
  0xe4   : > { %v354_v51 = vmul.f32 %v350_v46, %v348_v48  ;;  %v353_v52 = vmul.f32 %v349_v47, %v348_v48  ;;  %v356_v55 = vmul.f32 %v352_v49, %v348_v48  ;;  %v355_v56 = vmul.f32 %v351_v50, %v348_v48 }
  0xe6   : > { %v360_v53 = vsel %vm335_vm1, %v354_v51, 0.0  ;;  %v357_v54 = vsel %vm335_vm1, %v353_v52, 0.0  ;;  %v366_v57 = vsel %vm335_vm1, %v356_v55, 0.0  ;;  %v363_v58 = vsel %vm335_vm1, %v355_v56, 0.0 }
  0xe7   : > { %361 = vadd.xlane.f32.xlu1 %v360_v53  ;;  %358 = vadd.xlane.f32.xlu0 %v357_v54 }
  0xeb   : > { %367 = vadd.xlane.f32.xlu1 %v366_v57  ;;  %364 = vadd.xlane.f32.xlu0 %v363_v58 }
 0x118   : > { %v295_v59 = vpop.f32.mrb[0].mxu0 }
 0x119   : > { %v297_v60 = vpop.f32.mrb[1].mxu0  ;;  %v300_v61 = vsub.f32 0.0, %v295_v59 }
 0x11a   : > { %v301_v62 = vsub.f32 0.0, %v297_v60 }
 0x11b   : > { %v302_v63 = vmul.f32 1.442695, %v300_v61 }
 0x11c   : > { %v304_v0 = vmul.f32 1.442695, %v301_v62 }
 0x11d   : > { %592 = vpow2.f32 %v302_v63 }
 0x11e   : > { %594 = vpow2.f32 %v304_v0 }
 0x127   : > { %v593_v15 = vpop.eup %592 }
 0x128   : > { %v595_v18 = vpop.eup %594  ;;  %v306_v21 = vadd.f32 1.0, %v593_v15 }
 0x129   : > { %v307_v24 = vadd.f32 1.0, %v595_v18 }
 0x174   : > { %v362_v4 = vpop.xlane.xlu1 %361  ;;  %v359_v8 = vpop.xlane.xlu0 %358 }
 0x175   : > { %v370_v11 = vsub.f32 0.0, %v362_v4  ;;  %v369_v12 = vsub.f32 0.0, %v359_v8 }
 0x177   : > { %v375_v13 = vmul.f32 1.442695, %v370_v11  ;;  %v373_v14 = vmul.f32 1.442695, %v369_v12 }
 0x178   : > { %v368_v16 = vpop.xlane.xlu1 %367  ;;  %v365_v17 = vpop.xlane.xlu0 %364 }
 0x179   : > { %596 = vpow2.f32 %v375_v13  ;;  %v372_v19 = vsub.f32 0.0, %v368_v16  ;;  %v371_v20 = vsub.f32 0.0, %v365_v17 }
 0x17a   : > { %598 = vpow2.f32 %v373_v14 }
 0x17b   : > { %v379_v22 = vmul.f32 1.442695, %v372_v19  ;;  %v377_v23 = vmul.f32 1.442695, %v371_v20 }
 0x17d   : > { %600 = vpow2.f32 %v379_v22 }
 0x17e   : > { %602 = vpow2.f32 %v377_v23 }
 0x17f   : > { %604 = vrcp.f32 %v306_v21 }
 0x180   : > { %606 = vrcp.f32 %v307_v24 }
 0x183   : > { %v597_v26 = vpop.eup %596 }
 0x184   : > { %v599_v27 = vpop.eup %598  ;;  %v382_v28 = vadd.f32 1.0, %v597_v26 }
 0x185   : > { %v381_v30 = vadd.f32 1.0, %v599_v27 }
 0x186   : > { %608 = vrcp.f32 %v382_v28 }
 0x187   : > { %v601_v31 = vpop.eup %600  ;;  %610 = vrcp.f32 %v381_v30 }
 0x188   : > { %v603_v32 = vpop.eup %602  ;;  %v384_v33 = vadd.f32 1.0, %v601_v31 }
 0x189   : > { %v605_v34 = vpop.eup %604  ;;  %v383_v36 = vadd.f32 1.0, %v603_v32 }
 0x18a   : > { %v607_v37 = vpop.eup %606  ;;  %612 = vrcp.f32 %v384_v33  ;;  %v392_v38 = vrot.slane %v605_v34, %v391_v35 }
 0x18b   : > { %614 = vrcp.f32 %v383_v36  ;;  %v396_v39 = vrot.slane %v607_v37, %v391_v35 }
 0x190   : > { %v609_v40 = vpop.eup %608 }
 0x191   : > { %v611_v41 = vpop.eup %610  ;;  %v399_v42 = vmul.f32 %v609_v40, %v392_v38  ;;  %v400_v43 = vmul.f32 %v609_v40, %v396_v39 }
 0x192   : > { %v397_v44 = vmul.f32 %v611_v41, %v392_v38  ;;  %v398_v45 = vmul.f32 %v611_v41, %v396_v39 }
 0x193   : > { %v407_v46 = vadd.f32 1.0, %v399_v42  ;;  %v408_v47 = vadd.f32 1.0, %v400_v43 }
 0x194   : > { %v613_v48 = vpop.eup %612  ;;  %v405_v49 = vadd.f32 1.0, %v397_v44  ;;  %v406_v50 = vadd.f32 1.0, %v398_v45 }
 0x195   : > { %v615_v51 = vpop.eup %614  ;;  %v415_v52 = vmul.f32 %v407_v46, %v870_v6  ;;  %v416_v53 = vmul.f32 %v408_v47, %v872_v7  ;;  %v403_v54 = vmul.f32 %v613_v48, %v392_v38  ;;  %v404_v55 = vmul.f32 %v613_v48, %v396_v39 }
 0x196   : > { %v413_v56 = vmul.f32 %v405_v49, %v860_v1  ;;  %v414_v57 = vmul.f32 %v406_v50, %v862_v2  ;;  %v401_v58 = vmul.f32 %v615_v51, %v392_v38  ;;  %v402_v59 = vmul.f32 %v615_v51, %v396_v39 }
 0x197   : > { %423 = vst [vmem:[%s215_s12 + $0x10] sm:$0xff] %v415_v52  ;;  %424 = vst [vmem:[%s215_s12 + $0x18] sm:$0xff] %v416_v53  ;;  %v411_v60 = vadd.f32 1.0, %v403_v54  ;;  %v412_v61 = vadd.f32 1.0, %v404_v55 }
 0x198   : > { %421 = vst [vmem:[%s215_s12] sm:$0xff] %v413_v56  ;;  %422 = vst [vmem:[%s215_s12 + $0x8] sm:$0xff] %v414_v57  ;;  %v409_v6 = vadd.f32 1.0, %v401_v58  ;;  %v410_v7 = vadd.f32 1.0, %v402_v59 }
 0x199   : > { %v419_v1 = vmul.f32 %v411_v60, %v876_v9  ;;  %v420_v2 = vmul.f32 %v412_v61, %v878_v10 }
 0x19a   : > { %v417_v62 = vmul.f32 %v409_v6, %v864_v3  ;;  %v418_v63 = vmul.f32 %v410_v7, %v868_v5 }
 0x19b   : > { %427 = vst [vmem:[%s215_s12 + $0x30] sm:$0xff] %v419_v1  ;;  %428 = vst [vmem:[%s215_s12 + $0x38] sm:$0xff] %v420_v2 }
 0x19c   : > { %425 = vst [vmem:[%s215_s12 + $0x20] sm:$0xff] %v417_v62  ;;  %426 = vst [vmem:[%s215_s12 + $0x28] sm:$0xff] %v418_v63 }
 0x19d   : > { %659 = shalt.err (!%p656_p2)
}
 0x19e   : > { %s660_s9 = scalar_lea.hbm %s939_s19, 1024  ;;  %s664_s26 = scalar_lea.hbm %s991_s4, 2048 }
 0x19f   : > { %p661_p4 = scmp.ne.s32.totalorder %s939_s19, %s660_s9  ;;  %p665_p9 = scmp.lt.u32.totalorder %s939_s19, %s991_s4 }
 0x1a0   : > { %p666_p1 = scmp.lt.u32.totalorder %s664_s26, %s660_s9  ;;  %p668_p6 = scmp.lt.u32.totalorder %s660_s9, %s939_s19 }
 0x1a1   : > { %p662_p5 = pnand %p661_p4, %p998_p11 }
 0x1a2   : > { %p667_p3 = por %p666_p1, %p665_p9 }
 0x1a3   : > { %p663_p7 = pneg %p662_p5 }
 0x1a4   : > { %p669_p12 = por %p668_p6, %p667_p3 }
 0x1a6   : > { %p670_p13 = pnand %p669_p12, %p663_p7 }
 0x1a8   : > { %673 = shalt.err (!%p670_p13)
}
 0x1a9   : > { %s719_s11 = smov 256   ;;  %s720_s12 = smov 16  }
 0x1aa   : > { %543 = dma.vmem_to_hbm [thread:$0]  (%p998_p11), %s941_s23, 1024, %s939_s19, %s430_s14, %s719_s11, %s719_s11, %s720_s12  }
 0x1ab PF: > { %s458_s25 = sand.u32 1, %s700_s15   ;;  %p999_p8 = scmp.ne.s32.totalorder %s996_s28, 0 }
 0x1ac   : > { %p1000_p10 = scmp.ge.s32.totalorder %s712_s18, 2  ;;  %s459_s29 = scalar_lea.sflag [#allocation4], %s458_s25 }
 0x1ae   : > { %p550_p0 = pnand %p1000_p10, %p999_p8 }
 0x1b0   : > { %695 = dma.done.wait (!%p550_p0), %s459_s29, 1024  }
 0x1b1   : > { %697 = vsyncadd (!%p550_p0), %s459_s29, 4294966272  ;;  %p17_p2 = scmp.ge.s32.totalorder %s771_s21, 4   ;;  %s1001_s15 = smov %s704_s16 }
 0x1b2   : > { %s1002_s16 = smov %s708_s17  ;;  %s1003_s17 = smov %s783_s24 }
 0x1b3   : > { %s1004_s18 = smov %s771_s21  ;;  %19 = sbr.rel (!%p17_p2) target bundleno = 5 (0x5), region = 81 }
 0x1ba   :  { %464 = vsyncpa [#allocation3], 1 }
 0x1bb   :  { %466 = vsyncpa [#allocation3 + $0x1], 1 }
 0x1bc   :  { %467 = vsyncpa [#allocation4], 1 }
 0x1bd   :  { %469 = vsyncpa [#allocation4 + $0x1], 1 }

</bundles_post_ra>
